<compile_context>
chip_gen: v7x
topology: tpu7x:2x2x1
jax: 0.10.0
libtpu: 0.0.40
codegen_flags: <defaults>
</compile_context>

<pallas_src>
import functools
import math

import jax
import jax.numpy as jnp
from jax import lax
from jax.experimental import pallas as pl
from jax.experimental.pallas import tpu as pltpu

# Large finite negative instead of -inf so a fully-masked kv *tile* cannot poison
# the online-softmax running max (exp(-inf - (-inf)) = NaN).
_MASK_VALUE = -0.7 * float(jnp.finfo(jnp.float32).max)


def _flash_attn_kernel(*refs, scale, dropout_p, has_mask, has_dropout):
    it = iter(refs)
    q_ref = next(it)                                  # (1, E1, tq)
    k_ref = next(it)                                  # (1, E1, tk)
    v_ref = next(it)                                  # (1, E2, tk)
    mask_ref = next(it) if has_mask else None         # (1, tq, tk) int8
    keep_ref = next(it) if has_dropout else None      # (1, tq, tk) int8
    o_ref = next(it)                                  # (1, E2, tq)
    m_ref = next(it)                                  # (tq, 1) f32 running max
    l_ref = next(it)                                  # (tq, 1) f32 running denom
    acc_ref = next(it)                                # (tq, E2) f32 running numerator

    ki = pl.program_id(2)

    @pl.when(ki == 0)
    def _init():
        m_ref[...] = jnp.full(m_ref.shape, _MASK_VALUE, m_ref.dtype)
        l_ref[...] = jnp.zeros(l_ref.shape, l_ref.dtype)
        acc_ref[...] = jnp.zeros(acc_ref.shape, acc_ref.dtype)

    q = q_ref[0]                                      # (E1, tq), native dtype
    k = k_ref[0]                                      # (E1, tk)
    v = v_ref[0]                                      # (E2, tk)

    # scores[s1, s2] = sum_e q[e, s1] * k[e, s2] : contract E directly on the MXU
    # (no transposed copy of Q/K), accumulate in f32.
    s = lax.dot_general(q, k, (((0,), (0,)), ((), ())),
                        preferred_element_type=jnp.float32) * scale     # (tq, tk)
    if has_mask:
        s = jnp.where(mask_ref[0] != 0, s, _MASK_VALUE)

    m_prev = m_ref[...]                                                 # (tq, 1)
    m_new = jnp.maximum(m_prev, jnp.max(s, axis=-1, keepdims=True))
    alpha = jnp.exp(m_prev - m_new)                                     # (tq, 1)
    p = jnp.exp(s - m_new)                                              # (tq, tk) f32

    # Softmax denominator uses the *undropped* weights: the reference module
    # applies dropout AFTER the softmax normalization.
    l_ref[...] = alpha * l_ref[...] + jnp.sum(p, axis=-1, keepdims=True)
    m_ref[...] = m_new

    if has_dropout:
        keep = keep_ref[0] != 0
        p = jnp.where(keep, p * (1.0 / (1.0 - dropout_p)), 0.0)

    # acc[s1, e2] += sum_s2 p[s1, s2] * v[e2, s2]  (contract the kv axis directly)
    pv = lax.dot_general(p.astype(v.dtype), v, (((1,), (1,)), ((), ())),
                         preferred_element_type=jnp.float32)            # (tq, E2)
    acc_ref[...] = alpha * acc_ref[...] + pv

    @pl.when(ki == pl.num_programs(2) - 1)
    def _finalize():
        # One divide per query row, then a broadcast multiply.
        # (pl.reciprocal(l, approx=True) would push this onto the EUP on real
        #  TPU; a plain divide is kept for interpret-mode portability.)
        inv_l = 1.0 / l_ref[...]                                        # (tq, 1)
        out = acc_ref[...] * inv_l                                      # (tq, E2)
        o_ref[0] = out.T.astype(o_ref.dtype)                            # (E2, tq)


def _pick_tile(dim, preferred):
    """Largest preferred tile that evenly divides `dim`, else the full extent."""
    for t in preferred:
        if dim >= t and dim % t == 0:
            return t
    return dim


def _dropout_keep_mask(rng, dropout_p, shape):
    return jax.random.bernoulli(rng, 1.0 - dropout_p, shape).astype(jnp.int8)


def permuted_scaled_dot_product_attention(query, key, value, attention_mask=None,
                                          *, dropout_p=0.0, dropout_rng=None):
    """Pallas TPU permuted scaled dot-product attention.

    query: (B, E1, S1), key: (B, E1, S2), value: (B, E2, S2)
    attention_mask: optional (B, S1, S2) bool; False => weight zeroed out.
    Returns (B, E2, S1) in query.dtype.
    """
    B, E1, S1 = query.shape
    Bk, E1k, S2 = key.shape
    Bv, E2, S2v = value.shape
    assert B == Bk == Bv and E1 == E1k and S2 == S2v

    # 256-aligned q tiles / up-to-512 kv tiles keep the v6e/v7x MXU full while
    # bounding VMEM to a few MiB; small dims fall back to the full extent
    # (which also satisfies the (8,128) block constraint).
    tq = _pick_tile(S1, (256, 128))
    tk = _pick_tile(S2, (512, 256, 128))
    n_q = S1 // tq
    n_kv = S2 // tk

    scale = 1.0 / math.sqrt(E1)
    has_mask = attention_mask is not None
    has_dropout = float(dropout_p) > 0.0

    inputs = [query, key, value]
    in_specs = [
        pl.BlockSpec((1, E1, tq), lambda b, qi, ki: (b, 0, qi)),   # query
        pl.BlockSpec((1, E1, tk), lambda b, qi, ki: (b, 0, ki)),   # key
        pl.BlockSpec((1, E2, tk), lambda b, qi, ki: (b, 0, ki)),   # value
    ]
    if has_mask:
        inputs.append(attention_mask.astype(jnp.int8))             # int8, not int32
        in_specs.append(pl.BlockSpec((1, tq, tk), lambda b, qi, ki: (b, qi, ki)))
    if has_dropout:
        if dropout_rng is None:
            dropout_rng = jax.random.PRNGKey(0)
        # TODO(synk): torch's RNG stream is not reproduced; the dropout pattern
        # comes from jax.random (precomputed keep-mask, no in-kernel PRNG).
        inputs.append(_dropout_keep_mask(dropout_rng, float(dropout_p), (B, S1, S2)))
        in_specs.append(pl.BlockSpec((1, tq, tk), lambda b, qi, ki: (b, qi, ki)))

    kernel = functools.partial(
        _flash_attn_kernel, scale=scale, dropout_p=float(dropout_p),
        has_mask=has_mask, has_dropout=has_dropout)

    return pl.pallas_call(
        kernel,
        out_shape=jax.ShapeDtypeStruct((B, E2, S1), query.dtype),
        grid_spec=pltpu.PrefetchScalarGridSpec(
            num_scalar_prefetch=0,
            grid=(B, n_q, n_kv),
            in_specs=in_specs,
            out_specs=pl.BlockSpec((1, E2, tq), lambda b, qi, ki: (b, 0, qi)),
            scratch_shapes=[
                pltpu.VMEM((tq, 1), jnp.float32),    # running max m
                pltpu.VMEM((tq, 1), jnp.float32),    # running denominator l
                pltpu.VMEM((tq, E2), jnp.float32),   # running numerator acc
            ]),
        compiler_params=pltpu.CompilerParams(
            dimension_semantics=("parallel", "parallel", "arbitrary"),
            vmem_limit_bytes=48 * 1024 * 1024),
    )(*inputs)


def _reference(query, key, value, attention_mask=None, keep=None, dropout_p=0.0):
    dk = key.shape[-2]
    scores = jnp.einsum("bes,bet->bst", query, key,
                        precision=lax.Precision.HIGHEST) / math.sqrt(dk)
    if attention_mask is not None:
        scores = jnp.where(attention_mask, scores, -jnp.inf)
    w = jax.nn.softmax(scores, axis=-1)
    if keep is not None:
        w = jnp.where(keep != 0, w / (1.0 - dropout_p), 0.0)
    return jnp.einsum("bft,bst->bfs", value, w, precision=lax.Precision.HIGHEST)


if __name__ == "__main__":
    root = jax.random.PRNGKey(0)
    kq, kk, kv, km, kq2, kk2, kv2, km2 = jax.random.split(root, 8)

    # --- Case 1: small shapes in the module's permuted (B, E, S) convention ---
    B, E1, E2, S1, S2 = 2, 32, 16, 8, 16
    q = jax.random.normal(kq, (B, E1, S1), dtype=jnp.float32)
    k = jax.random.normal(kk, (B, E1, S2), dtype=jnp.float32)
    v = jax.random.normal(kv, (B, E2, S2), dtype=jnp.float32)
    mask = jax.random.uniform(km, (B, S1, S2)) > 0.25
    mask = mask.at[:, :, 0].set(True)          # keep at least one key per row

    out = jax.block_until_ready(
        permuted_scaled_dot_product_attention(q, k, v, mask, dropout_p=0.0))
    assert out.shape == (B, E2, S1)
    assert jnp.allclose(out, _reference(q, k, v, mask), atol=1e-4, rtol=1e-4)

    # mask=None path (mask stream is skipped entirely).
    out_nm = jax.block_until_ready(
        permuted_scaled_dot_product_attention(q, k, v, None, dropout_p=0.0))
    assert jnp.allclose(out_nm, _reference(q, k, v, None), atol=1e-4, rtol=1e-4)

    # Dropout path: kernel vs reference using the identical keep mask.
    dp = 0.3
    drop_rng = jax.random.PRNGKey(42)
    out_do = jax.block_until_ready(
        permuted_scaled_dot_product_attention(q, k, v, mask,
                                              dropout_p=dp, dropout_rng=drop_rng))
    keep = _dropout_keep_mask(drop_rng, dp, (B, S1, S2))
    assert jnp.allclose(out_do, _reference(q, k, v, mask, keep=keep, dropout_p=dp),
                        atol=1e-4, rtol=1e-4)

    # --- Case 2: longer sequences so the online-softmax kv loop runs >1 tile ---
    B2, E1b, E2b, S1b, S2b = 2, 32, 32, 256, 384      # -> tq=256, tk=128, 3 kv steps
    q2 = jax.random.normal(kq2, (B2, E1b, S1b), dtype=jnp.float32)
    k2 = jax.random.normal(kk2, (B2, E1b, S2b), dtype=jnp.float32)
    v2 = jax.random.normal(kv2, (B2, E2b, S2b), dtype=jnp.float32)
    mask2 = jax.random.uniform(km2, (B2, S1b, S2b)) > 0.25
    mask2 = mask2.at[:, :, 0].set(True)

    out2 = jax.block_until_ready(
        permuted_scaled_dot_product_attention(q2, k2, v2, mask2, dropout_p=0.0))
    assert out2.shape == (B2, E2b, S1b)
    assert jnp.allclose(out2, _reference(q2, k2, v2, mask2), atol=1e-4, rtol=1e-4)

    print("KERNEL_OK")
</pallas_src>

<mosaic_0001>
module attributes {stable_mosaic.version = 11 : i64} {
  func.func @_flash_attn_kernel(%arg0: i32, %arg1: i32, %arg2: i32, %arg3: memref<1x32x8xf32, #tpu.memory_space<vmem>>, %arg4: memref<1x32x16xf32, #tpu.memory_space<vmem>>, %arg5: memref<1x16x16xf32, #tpu.memory_space<vmem>>, %arg6: memref<1x8x16xi8, #tpu.memory_space<vmem>>, %arg7: memref<1x16x8xf32, #tpu.memory_space<vmem>>, %arg8: memref<8x1xf32, #tpu.memory_space<vmem>>, %arg9: memref<8x1xf32, #tpu.memory_space<vmem>>, %arg10: memref<8x16xf32, #tpu.memory_space<vmem>>) attributes {dimension_semantics = [#tpu.dimension_semantics<parallel>, #tpu.dimension_semantics<parallel>, #tpu.dimension_semantics<arbitrary>], iteration_bounds = array<i64: 2, 1, 1>, scalar_prefetch = 0 : i64, scratch_operands = 3 : i64, tpu.core_type = #tpu.core_type<tc>, window_params = [{transform_indices = @transform_0, window_bounds = array<i64: 1, 32, 8>}, {transform_indices = @transform_1, window_bounds = array<i64: 1, 32, 16>}, {transform_indices = @transform_2, window_bounds = array<i64: 1, 16, 16>}, {transform_indices = @transform_3, window_bounds = array<i64: 1, 8, 16>}, {transform_indices = @transform_4, window_bounds = array<i64: 1, 16, 8>}]} {
    %c0_i32 = arith.constant 0 : i32
    %0 = arith.cmpi eq, %arg2, %c0_i32 : i32
    %1 = arith.extui %0 : i1 to i32
    %c0_i32_0 = arith.constant 0 : i32
    %2 = arith.cmpi ne, %1, %c0_i32_0 : i32
    scf.if %2 {
      %cst_31 = arith.constant -2.38197633E+38 : f32
      %43 = vector.broadcast %cst_31 : f32 to vector<8x1xf32>
      %c0_32 = arith.constant 0 : index
      %c0_33 = arith.constant 0 : index
      %44 = vector.load %arg8[%c0_32, %c0_33] : memref<8x1xf32, #tpu.memory_space<vmem>>, vector<8x1xf32>
      tpu.vector_store %arg8[%c0_32, %c0_33], %43 {strides = array<i32>} : memref<8x1xf32, #tpu.memory_space<vmem>>, vector<8x1xf32>,
      %cst_34 = arith.constant 0.000000e+00 : f32
      %45 = vector.broadcast %cst_34 : f32 to vector<8x1xf32>
      %c0_35 = arith.constant 0 : index
      %c0_36 = arith.constant 0 : index
      %46 = vector.load %arg9[%c0_35, %c0_36] : memref<8x1xf32, #tpu.memory_space<vmem>>, vector<8x1xf32>
      tpu.vector_store %arg9[%c0_35, %c0_36], %45 {strides = array<i32>} : memref<8x1xf32, #tpu.memory_space<vmem>>, vector<8x1xf32>,
      %cst_37 = arith.constant 0.000000e+00 : f32
      %47 = vector.broadcast %cst_37 : f32 to vector<8x16xf32>
      %c0_38 = arith.constant 0 : index
      %c0_39 = arith.constant 0 : index
      %48 = vector.load %arg10[%c0_38, %c0_39] : memref<8x16xf32, #tpu.memory_space<vmem>>, vector<8x16xf32>
      tpu.vector_store %arg10[%c0_38, %c0_39], %47 {strides = array<i32>} : memref<8x16xf32, #tpu.memory_space<vmem>>, vector<8x16xf32>,
    } else {
    }
    %c0 = arith.constant 0 : index
    %c0_1 = arith.constant 0 : index
    %c0_2 = arith.constant 0 : index
    %3 = vector.load %arg3[%c0, %c0_1, %c0_2] : memref<1x32x8xf32, #tpu.memory_space<vmem>>, vector<1x32x8xf32>
    %4 = vector.shape_cast %3 : vector<1x32x8xf32> to vector<32x8xf32>
    %c0_3 = arith.constant 0 : index
    %c0_4 = arith.constant 0 : index
    %c0_5 = arith.constant 0 : index
    %5 = vector.load %arg4[%c0_3, %c0_4, %c0_5] : memref<1x32x16xf32, #tpu.memory_space<vmem>>, vector<1x32x16xf32>
    %6 = vector.shape_cast %5 : vector<1x32x16xf32> to vector<32x16xf32>
    %c0_6 = arith.constant 0 : index
    %c0_7 = arith.constant 0 : index
    %c0_8 = arith.constant 0 : index
    %7 = vector.load %arg5[%c0_6, %c0_7, %c0_8] : memref<1x16x16xf32, #tpu.memory_space<vmem>>, vector<1x16x16xf32>
    %8 = vector.shape_cast %7 : vector<1x16x16xf32> to vector<16x16xf32>
    %cst = arith.constant dense<0.000000e+00> : vector<8x16xf32>
    %9 = tpu.matmul %4, %6, %cst {dimension_numbers = #tpu.dot_dimension_numbers<[0], [0], [1], [1], [0, 1, 1, 1], [], []>} : vector<32x8xf32>, vector<32x16xf32>, vector<8x16xf32> -> vector<8x16xf32>
    %cst_9 = arith.constant 0.176776692 : f32
    %10 = vector.broadcast %cst_9 : f32 to vector<8x16xf32>
    %11 = arith.mulf %9, %10 : vector<8x16xf32>
    %c0_10 = arith.constant 0 : index
    %c0_11 = arith.constant 0 : index
    %c0_12 = arith.constant 0 : index
    %12 = vector.load %arg6[%c0_10, %c0_11, %c0_12] : memref<1x8x16xi8, #tpu.memory_space<vmem>>, vector<1x8x16xi8>
    %13 = vector.shape_cast %12 : vector<1x8x16xi8> to vector<8x16xi8>
    %c0_i8 = arith.constant 0 : i8
    %14 = vector.broadcast %c0_i8 : i8 to vector<8x16xi8>
    %15 = arith.cmpi ne, %13, %14 : vector<8x16xi8>
    %cst_13 = arith.constant -2.38197633E+38 : f32
    %16 = vector.broadcast %cst_13 : f32 to vector<8x16xf32>
    %17 = arith.select %15, %11, %16 : vector<8x16xi1>, vector<8x16xf32>
    %c0_14 = arith.constant 0 : index
    %c0_15 = arith.constant 0 : index
    %18 = vector.load %arg8[%c0_14, %c0_15] : memref<8x1xf32, #tpu.memory_space<vmem>>, vector<8x1xf32>
    %cst_16 = arith.constant dense<0xFF800000> : vector<8xf32>
    %19 = vector.multi_reduction <maximumf>, %17, %cst_16 [1] : vector<8x16xf32> to vector<8xf32>
    %20 = vector.shape_cast %19 : vector<8xf32> to vector<8x1xf32>
    %21 = arith.maximumf %18, %20 : vector<8x1xf32>
    %22 = arith.subf %18, %21 : vector<8x1xf32>
    %23 = math.exp %22 : vector<8x1xf32>
    %24 = vector.broadcast %21 : vector<8x1xf32> to vector<8x16xf32>
    %25 = arith.subf %17, %24 : vector<8x16xf32>
    %26 = math.exp %25 : vector<8x16xf32>
    %c0_17 = arith.constant 0 : index
    %c0_18 = arith.constant 0 : index
    %27 = vector.load %arg9[%c0_17, %c0_18] : memref<8x1xf32, #tpu.memory_space<vmem>>, vector<8x1xf32>
    %28 = arith.mulf %23, %27 : vector<8x1xf32>
    %cst_19 = arith.constant dense<0.000000e+00> : vector<8xf32>
    %29 = vector.multi_reduction <add>, %26, %cst_19 [1] : vector<8x16xf32> to vector<8xf32>
    %30 = vector.shape_cast %29 : vector<8xf32> to vector<8x1xf32>
    %31 = arith.addf %28, %30 : vector<8x1xf32>
    %c0_20 = arith.constant 0 : index
    %c0_21 = arith.constant 0 : index
    %32 = vector.load %arg9[%c0_20, %c0_21] : memref<8x1xf32, #tpu.memory_space<vmem>>, vector<8x1xf32>
    tpu.vector_store %arg9[%c0_20, %c0_21], %31 {strides = array<i32>} : memref<8x1xf32, #tpu.memory_space<vmem>>, vector<8x1xf32>,
    %c0_22 = arith.constant 0 : index
    %c0_23 = arith.constant 0 : index
    %33 = vector.load %arg8[%c0_22, %c0_23] : memref<8x1xf32, #tpu.memory_space<vmem>>, vector<8x1xf32>
    tpu.vector_store %arg8[%c0_22, %c0_23], %21 {strides = array<i32>} : memref<8x1xf32, #tpu.memory_space<vmem>>, vector<8x1xf32>,
    %cst_24 = arith.constant dense<0.000000e+00> : vector<8x16xf32>
    %34 = tpu.matmul %26, %8, %cst_24 {dimension_numbers = #tpu.dot_dimension_numbers<[1], [1], [0], [0], [0, 0, 1, 0], [], []>} : vector<8x16xf32>, vector<16x16xf32>, vector<8x16xf32> -> vector<8x16xf32>
    %c0_25 = arith.constant 0 : index
    %c0_26 = arith.constant 0 : index
    %35 = vector.load %arg10[%c0_25, %c0_26] : memref<8x16xf32, #tpu.memory_space<vmem>>, vector<8x16xf32>
    %36 = vector.broadcast %23 : vector<8x1xf32> to vector<8x16xf32>
    %37 = arith.mulf %36, %35 : vector<8x16xf32>
    %38 = arith.addf %37, %34 : vector<8x16xf32>
    %c0_27 = arith.constant 0 : index
    %c0_28 = arith.constant 0 : index
    %39 = vector.load %arg10[%c0_27, %c0_28] : memref<8x16xf32, #tpu.memory_space<vmem>>, vector<8x16xf32>
    tpu.vector_store %arg10[%c0_27, %c0_28], %38 {strides = array<i32>} : memref<8x16xf32, #tpu.memory_space<vmem>>, vector<8x16xf32>,
    %c0_i32_29 = arith.constant 0 : i32
    %40 = arith.cmpi eq, %arg2, %c0_i32_29 : i32
    %41 = arith.extui %40 : i1 to i32
    %c0_i32_30 = arith.constant 0 : i32
    %42 = arith.cmpi ne, %41, %c0_i32_30 : i32
    scf.if %42 {
      %c0_31 = arith.constant 0 : index
      %c0_32 = arith.constant 0 : index
      %43 = vector.load %arg9[%c0_31, %c0_32] : memref<8x1xf32, #tpu.memory_space<vmem>>, vector<8x1xf32>
      %cst_33 = arith.constant 1.000000e+00 : f32
      %44 = vector.broadcast %cst_33 : f32 to vector<8x1xf32>
      %45 = arith.divf %44, %43 : vector<8x1xf32>
      %c0_34 = arith.constant 0 : index
      %c0_35 = arith.constant 0 : index
      %46 = vector.load %arg10[%c0_34, %c0_35] : memref<8x16xf32, #tpu.memory_space<vmem>>, vector<8x16xf32>
      %47 = vector.broadcast %45 : vector<8x1xf32> to vector<8x16xf32>
      %48 = arith.mulf %46, %47 : vector<8x16xf32>
      %49 = tpu.transpose %48, [1, 0] : vector<8x16xf32> -> vector<16x8xf32>
      %c0_36 = arith.constant 0 : index
      %c0_37 = arith.constant 0 : index
      %c0_38 = arith.constant 0 : index
      %50 = vector.load %arg7[%c0_36, %c0_37, %c0_38] : memref<1x16x8xf32, #tpu.memory_space<vmem>>, vector<1x16x8xf32>
      %51 = vector.shape_cast %50 : vector<1x16x8xf32> to vector<16x8xf32>
      %52 = vector.shape_cast %49 : vector<16x8xf32> to vector<1x16x8xf32>
      tpu.vector_store %arg7[%c0_36, %c0_37, %c0_38], %52 {strides = array<i32>} : memref<1x16x8xf32, #tpu.memory_space<vmem>>, vector<1x16x8xf32>,
    } else {
    }
    return
  }
  func.func @transform_0(%arg0: i32, %arg1: i32, %arg2: i32) -> (i32, i32, i32) {
    %c0_i32 = arith.constant 0 : i32
    %c0_i32_0 = arith.constant 0 : i32
    return %arg0, %c0_i32, %arg1 : i32, i32, i32
  }
  func.func @transform_1(%arg0: i32, %arg1: i32, %arg2: i32) -> (i32, i32, i32) {
    %c0_i32 = arith.constant 0 : i32
    %c0_i32_0 = arith.constant 0 : i32
    return %arg0, %c0_i32, %arg2 : i32, i32, i32
  }
  func.func @transform_2(%arg0: i32, %arg1: i32, %arg2: i32) -> (i32, i32, i32) {
    %c0_i32 = arith.constant 0 : i32
    %c0_i32_0 = arith.constant 0 : i32
    return %arg0, %c0_i32, %arg2 : i32, i32, i32
  }
  func.func @transform_3(%arg0: i32, %arg1: i32, %arg2: i32) -> (i32, i32, i32) {
    %c0_i32 = arith.constant 0 : i32
    return %arg0, %arg1, %arg2 : i32, i32, i32
  }
  func.func @transform_4(%arg0: i32, %arg1: i32, %arg2: i32) -> (i32, i32, i32) {
    %c0_i32 = arith.constant 0 : i32
    %c0_i32_0 = arith.constant 0 : i32
    return %arg0, %c0_i32, %arg1 : i32, i32, i32
  }
}

</mosaic_0001>

<bundles_post_ra>
// kernel: tpu_custom_call.1
= control target key start
LH: loop header
LB: loop body
LE: loop exit
PB: predicated region body
PF: predicated region fallthrough
CT: control target
= control target key end

     0   :  { %s924_s15 = smov 0   ;;  %s926_s16 = smov 0   ;;  %s986_s0 = inlined_call_operand.vmem [shape: f32[2,32,8], index: 0, kind: input, shape index: {}]   ;;  %s987_s1 = inlined_call_operand.vmem [shape: f32[2,32,16], index: 1, kind: input, shape index: {}]   ;;  %s988_s2 = inlined_call_operand.vmem [shape: f32[2,16,16], index: 2, kind: input, shape index: {}]   ;;  %s989_s3 = inlined_call_operand.vmem [shape: s8[2,8,16], index: 3, kind: input, shape index: {}]   ;;  %s990_s4 = inlined_call_operand.vmem [shape: f32[2,16,8], index: 4, kind: output, shape index: {}]  }
   0x1   :  { %s928_s17 = smov 0  }
   0x2 LB: > { %s33_s18 = sadd.s32 1, %s888_s16  ;;  %p777_p0 = scmp.ge.s32.totalorder %s892_s17, 1  ;;  %s892_s17 = sphi %s928_s17, %s14_s17   ;;  %s888_s16 = sphi %s926_s16, %s992_s16   ;;  %s884_s15 = sphi %s924_s15, %s991_s15  }
   0x3   : > { %p35_p1 = scmp.ge.s32.totalorder %s33_s18, 2  ;;  %p237_p2 = scmp.lt.s32.totalorder %s892_s17, 3 }
   0x5   : > { %s994_s18 = smov (%p35_p1, %s33_s18), 0  ;;  %p238_p3 = pnand %p777_p0, %p237_p2 }
   0x6   : > { %p295_p4 = scmp.lt.s32.totalorder (!%p238_p3), %s884_s15, 1  ;;  %vm343_vm0 = vcmask (!%p238_p3), 7168   ;;  %vm346_vm1 = vcmask (!%p238_p3), 130048   ;;  %v894_v0 = vmov (!%p238_p3), 0.0|0.0   ;;  %v895_v1 = vmov (!%p238_p3), 0.0  }
   0x7   : > { %241 = sbr.rel (%p238_p3) target bundleno = 1078 (0x436), region = 36  ;;  %823 = vmatprep.subr.bf16.mxu0 (!%p238_p3), %v894_v0  ;;  %345 = vst.msk [vmem:[#allocation3] sm:$0xff] (!%p238_p3), %vm343_vm0, %v895_v1  ;;  %829 = vmatprep.subr.bf16.mxu1 (!%p238_p3), %v894_v0  ;;  %vm896_vm2 = vmmov (!%p238_p3), 0   ;;  %vm390_vm3 = vcmask (!%p238_p3), 261120   ;;  %v897_v13 = vmov (!%p238_p3), 0   ;;  %vm831_vm6 = vmpackc.low (!%p238_p3), %vm346_vm1, %vm346_vm1  ;;  %vm630_vm7 = vcmask (!%p238_p3), 64512  }
   0x8   : > { %347 = vst.msk [vmem:[#allocation4] sm:$0xff] (!%p238_p3), %vm346_vm1, %v895_v1  ;;  %813 = vmatprep.mubr.msk.f32.mxu0 (!%p238_p3), %vm896_vm2, %v895_v1  ;;  %820 = vmatprep.mubr.msk.f32.mxu1 (!%p238_p3), %vm896_vm2, %v895_v1  ;;  %v898_v14 = vmov (!%p238_p3), -2.3819763e+38  }
   0x9   : > { %862 = vset.pattern.permute.xlu1 (!%p238_p3), %v897_v13  ;;  %344 = vst.msk [vmem:[#allocation2] sm:$0xff] (!%p238_p3), %vm343_vm0, %v898_v14 }
   0xe   : > { %s996_s15 = smov (!%p295_p4, %s884_s15), 1  ;;  %v488_v37 = vld [vmem:[#allocation3] sm:$0xff] }
   0xf   : > { %s793_s19 = sshll.u32 %s996_s15, 5  ;;  %s784_s26 = sshll.u32 %s996_s15, 1  ;;  %v576_v43 = vld [vmem:[#allocation4] sm:$0xff] }
  0x10   : > { %s302_s22 = scalar_lea.vmem %s986_s0, %s793_s19  ;;  %s310_s25 = scalar_lea.vmem %s987_s1, %s793_s19  ;;  %v471_v23 = vld [vmem:[#allocation2] sm:$0xff] }
  0x11   : > { %v348_v2 = vld [vmem:[%s302_s22] sm:$0xff]  ;;  %v353_v4 = vld [vmem:[%s310_s25 + $0x8] sm:$0xff]  ;;  %v354_v7 = vld [vmem:[%s310_s25 + $0x10] sm:$0xff]  ;;  %s328_s29 = scalar_lea.vmem %s989_s3, %s784_s26  ;;  %s795_s30 = sshll.u32 %s996_s15, 4 }
  0x12   : > { %358 = vxpose.xlu0.b32.start [1/4] (short) (narrow) %v348_v2, 8  ;;  %v352_v3 = vld [vmem:[%s310_s25] sm:$0xff]  ;;  %v349_v5 = vld [vmem:[%s302_s22 + $0x8] sm:$0xff]  ;;  %v355_v8 = vld [vmem:[%s310_s25 + $0x18] sm:$0xff]  ;;  %s318_s7 = scalar_lea.vmem %s988_s2, %s795_s30  ;;  %s336_s10 = scalar_lea.vmem %s990_s4, %s795_s30 }
  0x13   : > { %v824_v6 = vpack.c.bf16 %v353_v4, %v352_v3  ;;  %v827_v9 = vpack.c.bf16 %v355_v8, %v354_v7  ;;  %v350_v10 = vld [vmem:[%s302_s22 + $0x10] sm:$0xff]  ;;  %v351_v11 = vld [vmem:[%s302_s22 + $0x18] sm:$0xff]  ;;  %v465_v15 = vld [vmem:[%s328_s29] sm:$0x3] }
  0x14   : > { %vm466_vm4 = vnez %v465_v15  ;;  %v356_v28 = vld [vmem:[%s318_s7] sm:$0xff]  ;;  %v357_v29 = vld [vmem:[%s318_s7 + $0x8] sm:$0xff] }
  0x15   : > { %825 = vmatpush3.bf16.msra.mxu0 %v824_v6  ;;  %v467_v16 = vsel %vm466_vm4, 16843009, %v897_v13  ;;  %v830_v30 = vpack.c.bf16 %v357_v29, %v356_v28 }
  0x16   : > { %359 = vxpose.xlu0.b32.cont [2/4] (short) (narrow) %v349_v5, 8  ;;  %826 = vmatprep.subr.bf16.mxu0 %v894_v0  ;;  %v468_v17 = vunpack.c.0.s8 %v467_v16 }
  0x17   : > { %832 = vmatpush3.bf16.xpose.msk.msra.mxu1 %vm831_vm6, %v830_v30 }
  0x18   : > { %vm469_vm5 = vcmp.ne.s32.totalorder %v468_v17, 0 }
  0x19   : > { %828 = vmatpush3.bf16.msra.mxu0 %v827_v9 }
  0x1a   : > { %360 = vxpose.xlu0.b32.cont [3/4] (short) (narrow) %v350_v10, 8 }
  0x1e   : > { %361 = vxpose.xlu0.b32.end [4/4] (short) (narrow) %v351_v11, 8 }
  0x47   : > { %863 = vset.pattern.permute.xlu0 %v897_v13 }
  0x92   : > { %v374_v12 = vpop.trf.xlu0 }
  0x93   : > { %814 = vmatmul.mubr.msk.f32.vlgmr.msra.gmra.mrb[0].mxu0 %vm390_vm3, %v374_v12 }
 0x166   : > { %v460_v18 = vpop.f32.mrb[0].mxu0 }
 0x167   : > { %v464_v19 = vmul.f32 0.17677669, %v460_v18  ;;  %v815_v20 = vpop.f32.mrb[1].mxu0 }
 0x169   : > { %v470_v21 = vsel %vm469_vm5, %v464_v19, -2.3819763e+38 }
 0x16a   : > { %v473_v22 = vsel %vm346_vm1, %v470_v21, -inf }
 0x16b   : > { %474 = vmax.xlane.f32.xlu1 %v473_v22 }
 0x1f8   : > { %v475_v24 = vpop.xlane.xlu1 %474 }
 0x1f9   : > { %v476_v25 = vmax.f32 %v471_v23, %v475_v24 }
 0x1fb   : > { %v477_v26 = vsub.f32 %v471_v23, %v476_v25  ;;  %496 = vst.msk [vmem:[#allocation2] sm:$0xff] %vm343_vm0, %v476_v25  ;;  %482 = vperm.xlu1 %862, %v476_v25  }
 0x1fd   : > { %v478_v27 = vmul.f32 1.442695, %v477_v26 }
 0x1ff   : > { %864 = vpow2.f32 %v478_v27 }
 0x209   : > { %v865_v31 = vpop.eup %864 }
 0x20a   : > { %579 = vperm.xlu1 %862, %v865_v31   ;;  %v489_v38 = vmul.f32 %v865_v31, %v488_v37 }
 0x27a   : > { %v483_v32 = vpop.permute.xlu1 %482 }
 0x27b   : > { %v485_v33 = vsub.f32 %v470_v21, %v483_v32 }
 0x27d   : > { %v486_v34 = vmul.f32 1.442695, %v485_v33 }
 0x27f   : > { %866 = vpow2.f32 %v486_v34 }
 0x289   : > { %v867_v35 = vpop.eup %866  ;;  %v580_v44 = vpop.permute.xlu1 %579 }
 0x28a   : > { %821 = vmatmul.mubr.msk.f32.vlgmr.msra.gmra.mrb[0].mxu1 %vm346_vm1, %v867_v35  ;;  %v490_v36 = vsel %vm346_vm1, %v867_v35, 0.0  ;;  %v582_v45 = vmul.f32 %v580_v44, %v576_v43 }
 0x28b   : > { %491 = vadd.xlane.f32.xlu0 %v490_v36 }
 0x318   : > { %v492_v39 = vpop.xlane.xlu0 %491 }
 0x319   : > { %v493_v40 = vadd.f32 %v492_v39, %v489_v38 }
 0x31b   : > { %495 = vst.msk [vmem:[#allocation3] sm:$0xff] %vm343_vm0, %v493_v40 }
 0x322   : > { %v588_v41 = vld [vmem:[#allocation3] sm:$0xff] }
 0x323   : > { %868 = vrcp.f32 %v588_v41 }
 0x32d   : > { %v869_v42 = vpop.eup %868 }
 0x32e   : > { %594 = vperm.xlu1 %862, %v869_v42  }
 0x35d   : > { %v572_v46 = vpop.f32.mrb[0].mxu1 }
 0x35e   : > { %v583_v47 = vadd.f32 %v582_v45, %v572_v46  ;;  %v822_v48 = vpop.f32.mrb[1].mxu1 }
 0x360   : > { %584 = vst.msk [vmem:[#allocation4] sm:$0xff] %vm346_vm1, %v583_v47 }
 0x367   : > { %v591_v49 = vld [vmem:[#allocation4] sm:$0xff] }
 0x3ad   : > { %v595_v50 = vpop.permute.xlu1 %594 }
 0x3ae   : > { %v597_v51 = vmul.f32 %v595_v50, %v591_v49 }
 0x3b0   : > { %598 = vxpose.xlu1.b32.start.end [1/1] (short) (narrow) %v597_v51, 16 }
 0x430   : > { %v614_v52 = vpop.trf.xlu1 }
 0x431   : > { %631 = vst.msk [vmem:[%s336_s10] sm:$0xff] %vm630_vm7, %v614_v52 }
 0x434   : > { %v615_v53 = vpop.trf.xlu1 }
 0x435   : > { %632 = vst.msk [vmem:[%s336_s10 + $0x8] sm:$0xff] %vm630_vm7, %v615_v53 }
 0x436 PF: > { %s14_s17 = sadd.s32 1, %s892_s17   ;;  %s991_s15 = smov %s888_s16 }
 0x437   : > { %p11_p5 = scmp.ge.s32.totalorder %s14_s17, 4   ;;  %s992_s16 = smov %s994_s18 }
 0x439   :  { %13 = sbr.rel (!%p11_p5) target bundleno = 2 (0x2), region = 83 }

</bundles_post_ra>
